<compile_context>
chip_gen: v5e
topology: v5e:2x2
jax: 0.10.0
libtpu: 0.0.40
codegen_flags: <defaults>
</compile_context>

<pallas_src>
import functools

import jax
import jax.numpy as jnp
from jax.experimental import pallas as pl
from jax.experimental.pallas import tpu as pltpu

LEAKY_SLOPE = 0.01  # torch.nn.functional.leaky_relu default negative_slope


def _round_up(n, m):
    return ((n + m - 1) // m) * m


def _qn_kernel(x_ref, w_ref, b_ref, o_ref, *, in_dims, out_dims, b_offs):
    """Fused 6-layer MLP on one (TB, sd_k) batch tile.

    w_ref: single (6, K_max, N_max) bf16 weight stack, layer-sliced with static,
    tile-aligned offsets (bf16 sublane tile = 16 rows, lane tile = 128 cols).
    b_ref: one packed (1, sum(out_dims)) f32 bias row, lane-aligned offsets.
    Matmuls run on the MXU with bf16 operands and f32 accumulation; biases and
    activations stay in f32 and are cast back to bf16 between layers.
    """

    def leaky(h):
        # max(h, 0.01*h) == leaky_relu(h): one VALU max instead of cmp+select.
        return jnp.maximum(h, LEAKY_SLOPE * h)

    def linear(h_bf16, layer):
        k, n = in_dims[layer], out_dims[layer]
        w = w_ref[layer, :k, :n]                      # static, aligned ref slice
        acc = jnp.dot(h_bf16, w, preferred_element_type=jnp.float32)
        return acc + b_ref[:, b_offs[layer]:b_offs[layer] + n]

    h = x_ref[...].astype(jnp.bfloat16)               # (TB, sd_k), cast in-kernel
    h = leaky(linear(h, 0)).astype(jnp.bfloat16)
    h = leaky(linear(h, 1)).astype(jnp.bfloat16)
    # sigmoid(z) = 1 / (1 + exp(-z)): exp and approx reciprocal both run on the
    # EUP (separate bundle slot) instead of a VPU divide.
    z = linear(h, 2)
    h = pl.reciprocal(1.0 + jnp.exp(-z), approx=True).astype(jnp.bfloat16)
    h = leaky(linear(h, 3)).astype(jnp.bfloat16)
    h = leaky(linear(h, 4)).astype(jnp.bfloat16)
    o_ref[...] = linear(h, 5).astype(o_ref.dtype)


def prepare_qn_params(params, state_dim, action_dim):
    """One-time packing / bf16 casting of the 6 (W, b) pairs.

    Weights come in as (in, out) f32; they are cast to bf16 and packed into a
    single (6, K_max, N_max) stack.  fc1's K is only rounded to the bf16
    sublane tile (16), not 128, so x never needs a 128-wide feature pad.
    Biases are packed into one f32 row with lane-aligned (x128) offsets.
    """
    sd_k = _round_up(max(state_dim, 16), 16)
    ad_p = _round_up(max(action_dim, 128), 128)
    in_dims = (sd_k, 128, 128, 128, 128, 256)
    out_dims = (128, 128, 128, 128, 256, ad_p)
    k_max = max(256, max(in_dims))
    n_max = max(256, max(out_dims))

    w_stack = jnp.zeros((6, k_max, n_max), jnp.bfloat16)
    bias_chunks, b_offs = [], []
    off = 0
    for layer, (w, b) in enumerate(params):
        w = jnp.asarray(w, jnp.float32)
        b = jnp.asarray(b, jnp.float32)
        w_stack = w_stack.at[layer, :w.shape[0], :w.shape[1]].set(
            w.astype(jnp.bfloat16))
        bias_chunks.append(
            jnp.pad(b.reshape(1, -1),
                    ((0, 0), (0, out_dims[layer] - b.shape[0]))))
        b_offs.append(off)
        off += out_dims[layer]
    bias = jnp.concatenate(bias_chunks, axis=1)       # (1, sum(out_dims)) f32

    return dict(w_stack=w_stack, bias=bias,
                in_dims=in_dims, out_dims=out_dims, b_offs=tuple(b_offs),
                sd_k=sd_k, ad_p=ad_p,
                state_dim=state_dim, action_dim=action_dim)


def qn_forward(x, prepared, out_dtype=jnp.float32):
    """x: (B, state_dim) float.  Returns (B, action_dim) Q-values in out_dtype.

    Pass out_dtype=jnp.bfloat16 to halve output writeback bytes (mainly a v5e
    win); accuracy is already bf16-level (bf16 weights, approx reciprocal).
    """
    state_dim = prepared["state_dim"]
    action_dim = prepared["action_dim"]
    sd_k, ad_p = prepared["sd_k"], prepared["ad_p"]
    in_dims, out_dims, b_offs = (prepared["in_dims"], prepared["out_dims"],
                                 prepared["b_offs"])
    w_stack, bias = prepared["w_stack"], prepared["bias"]

    B = x.shape[0]
    assert x.shape[1] == state_dim

    # ---- batch tile selection --------------------------------------------
    # Largest tile that still gives >=2 grid steps (amortise the ~0.35us fixed
    # per-step overhead AND let ("parallel",) shard batch tiles across v7x's
    # two TensorCores).  Tiny batches collapse to a single grid step.
    B8 = _round_up(max(B, 1), 8)
    TB = None
    for tb in (2048, 1024, 512, 256, 128):
        if B8 >= 2 * tb:
            TB = tb
            break
    if TB is None:
        TB = B8
    B_p = _round_up(B, TB)

    # ---- input: no feature-dim pad, no dtype cast in the wrapper ----------
    # Block last dim equals the full array dim, so no 128-alignment is needed;
    # the bf16 cast happens inside the kernel.  Only the batch pad to a
    # multiple of TB remains (plus a tiny 16-alignment pad for odd state_dims).
    x_in = x
    if not jnp.issubdtype(x_in.dtype, jnp.floating):
        x_in = x_in.astype(jnp.float32)
    pad_rows, pad_cols = B_p - B, sd_k - state_dim
    if pad_rows or pad_cols:
        x_in = jnp.pad(x_in, ((0, pad_rows), (0, pad_cols)))

    grid = (B_p // TB,)

    def build(single_buffer_resident):
        # Resident (constant index_map) weight/bias blocks: single-buffer them
        # — they are DMA'd once, double-buffering only wastes VMEM headroom
        # (matters most on v7x's 64 MiB VMEM).
        res_kw = (dict(pipeline_mode=pl.Buffered(1))
                  if single_buffer_resident else {})
        in_specs = [
            pl.BlockSpec((TB, sd_k), lambda i: (i, 0)),
            pl.BlockSpec(w_stack.shape, lambda i: (0, 0, 0), **res_kw),
            pl.BlockSpec(bias.shape, lambda i: (0, 0), **res_kw),
        ]
        return pl.pallas_call(
            functools.partial(_qn_kernel, in_dims=in_dims, out_dims=out_dims,
                              b_offs=b_offs),
            out_shape=jax.ShapeDtypeStruct((B_p, ad_p), out_dtype),
            grid=grid,
            in_specs=in_specs,
            out_specs=pl.BlockSpec((TB, ad_p), lambda i: (i, 0)),
            compiler_params=pltpu.CompilerParams(
                dimension_semantics=("parallel",),
                # TB=2048: ~2 MiB x/out blocks (double-buffered) + ~0.8 MiB
                # resident weights + a few MiB activation scratch << 32 MiB,
                # which is safe on all of v5e/v6e/v7x.
                vmem_limit_bytes=32 << 20),
        )

    try:
        out_p = build(True)(x_in, w_stack, bias)
    except Exception:
        # Fallback for jax versions without per-BlockSpec pipeline_mode /
        # single-buffer support; everything else is identical.
        out_p = build(False)(x_in, w_stack, bias)

    return out_p[:B, :action_dim]


def init_qn_params(key, state_dim, action_dim):
    """Deterministic init mirroring the PyTorch module's shapes.

    Weights ~ U(-0.15, 0.15) (as in the module); biases use PyTorch Linear's
    default U(-1/sqrt(fan_in), 1/sqrt(fan_in)).  Weights are returned already
    transposed to (in, out), in float32.
    """
    dims = [state_dim, 128, 128, 128, 128, 256, action_dim]
    params = []
    for i in range(6):
        fan_in, fan_out = dims[i], dims[i + 1]
        key, kw, kb = jax.random.split(key, 3)
        w = jax.random.uniform(kw, (fan_in, fan_out), jnp.float32, -0.15, 0.15)
        bound = 1.0 / jnp.sqrt(jnp.float32(fan_in))
        b = jax.random.uniform(kb, (fan_out,), jnp.float32, -bound, bound)
        params.append((w, b))
    return params


def qn_reference(x, params):
    """Pure-JAX f32 reference of the same forward pass (sanity check)."""
    def leaky(h):
        return jnp.where(h > 0, h, LEAKY_SLOPE * h)
    h = x
    h = leaky(h @ params[0][0] + params[0][1])
    h = leaky(h @ params[1][0] + params[1][1])
    h = jax.nn.sigmoid(h @ params[2][0] + params[2][1])
    h = leaky(h @ params[3][0] + params[3][1])
    h = leaky(h @ params[4][0] + params[4][1])
    return h @ params[5][0] + params[5][1]


# TODO(synk): the PyTorch module's train() path (SmoothL1Loss, SGD step, grad
# clipping) is training machinery outside the forward pass and is not ported.

if __name__ == "__main__":
    state_dim = 16
    action_dim = 4
    batch = 2

    key = jax.random.PRNGKey(0)
    key, kx, kx2 = jax.random.split(key, 3)
    params = init_qn_params(key, state_dim, action_dim)
    prepared = prepare_qn_params(params, state_dim, action_dim)  # one-time cost

    # Small-batch (latency-regime) check: single grid step, no feature pad/cast.
    x = jax.random.normal(kx, (batch, state_dim), jnp.float32)
    out = qn_forward(x, prepared)
    out = jax.block_until_ready(out)
    ref = qn_reference(x, params)
    assert out.shape == (batch, action_dim)
    assert jnp.allclose(out, ref, atol=5e-2, rtol=5e-2), (
        f"max abs err {jnp.max(jnp.abs(out - ref))}")

    # Multi-tile check: exercises TB=128, grid=(3,), batch padding 300 -> 384.
    x_big = jax.random.normal(kx2, (300, state_dim), jnp.float32)
    out_big = jax.block_until_ready(qn_forward(x_big, prepared))
    ref_big = qn_reference(x_big, params)
    assert out_big.shape == (300, action_dim)
    assert jnp.allclose(out_big, ref_big, atol=5e-2, rtol=5e-2), (
        f"max abs err {jnp.max(jnp.abs(out_big - ref_big))}")

    print("KERNEL_OK")
</pallas_src>

<mosaic_0001>
module attributes {stable_mosaic.version = 11 : i64} {
  func.func @_qn_kernel(%arg0: i32, %arg1: memref<8x16xf32, #tpu.memory_space<vmem>>, %arg2: memref<6x256x256xbf16, #tpu.memory_space<vmem>>, %arg3: memref<1x896xf32, #tpu.memory_space<vmem>>, %arg4: memref<8x128xf32, #tpu.memory_space<vmem>>) attributes {dimension_semantics = [#tpu.dimension_semantics<parallel>], iteration_bounds = array<i64: 1>, scalar_prefetch = 0 : i64, scratch_operands = 0 : i64, tpu.core_type = #tpu.core_type<tc>, window_params = [{transform_indices = @transform_0, window_bounds = array<i64: 8, 16>}, {pipeline_mode = #tpu.pipeline_mode<synchronous>, transform_indices = @transform_1, window_bounds = array<i64: 6, 256, 256>}, {pipeline_mode = #tpu.pipeline_mode<synchronous>, transform_indices = @transform_2, window_bounds = array<i64: 1, 896>}, {transform_indices = @transform_3, window_bounds = array<i64: 8, 128>}]} {
    %c0 = arith.constant 0 : index
    %c0_0 = arith.constant 0 : index
    %0 = vector.load %arg1[%c0, %c0_0] : memref<8x16xf32, #tpu.memory_space<vmem>>, vector<8x16xf32>
    %1 = arith.truncf %0 : vector<8x16xf32> to vector<8x16xbf16>
    %c0_1 = arith.constant 0 : index
    %c0_2 = arith.constant 0 : index
    %c0_3 = arith.constant 0 : index
    %2 = vector.load %arg2[%c0_1, %c0_2, %c0_3] : memref<6x256x256xbf16, #tpu.memory_space<vmem>>, vector<1x16x128xbf16>
    %3 = vector.shape_cast %2 : vector<1x16x128xbf16> to vector<16x128xbf16>
    %cst = arith.constant dense<0.000000e+00> : vector<8x128xf32>
    %4 = tpu.matmul %1, %3, %cst {dimension_numbers = #tpu.dot_dimension_numbers<[1], [0], [0], [1], [0, 0, 1, 1], [], []>} : vector<8x16xbf16>, vector<16x128xbf16>, vector<8x128xf32> -> vector<8x128xf32>
    %c0_4 = arith.constant 0 : index
    %c0_5 = arith.constant 0 : index
    %5 = vector.load %arg3[%c0_4, %c0_5] : memref<1x896xf32, #tpu.memory_space<vmem>>, vector<1x128xf32>
    %6 = vector.broadcast %5 : vector<1x128xf32> to vector<8x128xf32>
    %7 = arith.addf %4, %6 : vector<8x128xf32>
    %cst_6 = arith.constant 0.00999999977 : f32
    %8 = vector.broadcast %cst_6 : f32 to vector<8x128xf32>
    %9 = arith.mulf %8, %7 : vector<8x128xf32>
    %10 = arith.maximumf %7, %9 : vector<8x128xf32>
    %11 = arith.truncf %10 : vector<8x128xf32> to vector<8x128xbf16>
    %c1 = arith.constant 1 : index
    %c0_7 = arith.constant 0 : index
    %c0_8 = arith.constant 0 : index
    %12 = vector.load %arg2[%c1, %c0_7, %c0_8] : memref<6x256x256xbf16, #tpu.memory_space<vmem>>, vector<1x128x128xbf16>
    %13 = vector.shape_cast %12 : vector<1x128x128xbf16> to vector<128x128xbf16>
    %cst_9 = arith.constant dense<0.000000e+00> : vector<8x128xf32>
    %14 = tpu.matmul %11, %13, %cst_9 {dimension_numbers = #tpu.dot_dimension_numbers<[1], [0], [0], [1], [0, 0, 1, 1], [], []>} : vector<8x128xbf16>, vector<128x128xbf16>, vector<8x128xf32> -> vector<8x128xf32>
    %c0_10 = arith.constant 0 : index
    %c128 = arith.constant 128 : index
    %15 = vector.load %arg3[%c0_10, %c128] : memref<1x896xf32, #tpu.memory_space<vmem>>, vector<1x128xf32>
    %16 = vector.broadcast %15 : vector<1x128xf32> to vector<8x128xf32>
    %17 = arith.addf %14, %16 : vector<8x128xf32>
    %cst_11 = arith.constant 0.00999999977 : f32
    %18 = vector.broadcast %cst_11 : f32 to vector<8x128xf32>
    %19 = arith.mulf %18, %17 : vector<8x128xf32>
    %20 = arith.maximumf %17, %19 : vector<8x128xf32>
    %21 = arith.truncf %20 : vector<8x128xf32> to vector<8x128xbf16>
    %c2 = arith.constant 2 : index
    %c0_12 = arith.constant 0 : index
    %c0_13 = arith.constant 0 : index
    %22 = vector.load %arg2[%c2, %c0_12, %c0_13] : memref<6x256x256xbf16, #tpu.memory_space<vmem>>, vector<1x128x128xbf16>
    %23 = vector.shape_cast %22 : vector<1x128x128xbf16> to vector<128x128xbf16>
    %cst_14 = arith.constant dense<0.000000e+00> : vector<8x128xf32>
    %24 = tpu.matmul %21, %23, %cst_14 {dimension_numbers = #tpu.dot_dimension_numbers<[1], [0], [0], [1], [0, 0, 1, 1], [], []>} : vector<8x128xbf16>, vector<128x128xbf16>, vector<8x128xf32> -> vector<8x128xf32>
    %c0_15 = arith.constant 0 : index
    %c256 = arith.constant 256 : index
    %25 = vector.load %arg3[%c0_15, %c256] : memref<1x896xf32, #tpu.memory_space<vmem>>, vector<1x128xf32>
    %26 = vector.broadcast %25 : vector<1x128xf32> to vector<8x128xf32>
    %27 = arith.addf %24, %26 : vector<8x128xf32>
    %cst_16 = arith.constant 0.000000e+00 : f32
    %28 = vector.broadcast %cst_16 : f32 to vector<8x128xf32>
    %29 = arith.subf %28, %27 : vector<8x128xf32>
    %30 = math.exp %29 : vector<8x128xf32>
    %cst_17 = arith.constant 1.000000e+00 : f32
    %31 = vector.broadcast %cst_17 : f32 to vector<8x128xf32>
    %32 = arith.addf %31, %30 : vector<8x128xf32>
    %33 = tpu.reciprocal %32 {approx = true} : vector<8x128xf32> -> vector<8x128xf32>
    %34 = arith.truncf %33 : vector<8x128xf32> to vector<8x128xbf16>
    %c3 = arith.constant 3 : index
    %c0_18 = arith.constant 0 : index
    %c0_19 = arith.constant 0 : index
    %35 = vector.load %arg2[%c3, %c0_18, %c0_19] : memref<6x256x256xbf16, #tpu.memory_space<vmem>>, vector<1x128x128xbf16>
    %36 = vector.shape_cast %35 : vector<1x128x128xbf16> to vector<128x128xbf16>
    %cst_20 = arith.constant dense<0.000000e+00> : vector<8x128xf32>
    %37 = tpu.matmul %34, %36, %cst_20 {dimension_numbers = #tpu.dot_dimension_numbers<[1], [0], [0], [1], [0, 0, 1, 1], [], []>} : vector<8x128xbf16>, vector<128x128xbf16>, vector<8x128xf32> -> vector<8x128xf32>
    %c0_21 = arith.constant 0 : index
    %c384 = arith.constant 384 : index
    %38 = vector.load %arg3[%c0_21, %c384] : memref<1x896xf32, #tpu.memory_space<vmem>>, vector<1x128xf32>
    %39 = vector.broadcast %38 : vector<1x128xf32> to vector<8x128xf32>
    %40 = arith.addf %37, %39 : vector<8x128xf32>
    %cst_22 = arith.constant 0.00999999977 : f32
    %41 = vector.broadcast %cst_22 : f32 to vector<8x128xf32>
    %42 = arith.mulf %41, %40 : vector<8x128xf32>
    %43 = arith.maximumf %40, %42 : vector<8x128xf32>
    %44 = arith.truncf %43 : vector<8x128xf32> to vector<8x128xbf16>
    %c4 = arith.constant 4 : index
    %c0_23 = arith.constant 0 : index
    %c0_24 = arith.constant 0 : index
    %45 = vector.load %arg2[%c4, %c0_23, %c0_24] : memref<6x256x256xbf16, #tpu.memory_space<vmem>>, vector<1x128x256xbf16>
    %46 = vector.shape_cast %45 : vector<1x128x256xbf16> to vector<128x256xbf16>
    %cst_25 = arith.constant dense<0.000000e+00> : vector<8x256xf32>
    %47 = tpu.matmul %44, %46, %cst_25 {dimension_numbers = #tpu.dot_dimension_numbers<[1], [0], [0], [1], [0, 0, 1, 1], [], []>} : vector<8x128xbf16>, vector<128x256xbf16>, vector<8x256xf32> -> vector<8x256xf32>
    %c0_26 = arith.constant 0 : index
    %c512 = arith.constant 512 : index
    %48 = vector.load %arg3[%c0_26, %c512] : memref<1x896xf32, #tpu.memory_space<vmem>>, vector<1x256xf32>
    %49 = vector.broadcast %48 : vector<1x256xf32> to vector<8x256xf32>
    %50 = arith.addf %47, %49 : vector<8x256xf32>
    %cst_27 = arith.constant 0.00999999977 : f32
    %51 = vector.broadcast %cst_27 : f32 to vector<8x256xf32>
    %52 = arith.mulf %51, %50 : vector<8x256xf32>
    %53 = arith.maximumf %50, %52 : vector<8x256xf32>
    %54 = arith.truncf %53 : vector<8x256xf32> to vector<8x256xbf16>
    %c5 = arith.constant 5 : index
    %c0_28 = arith.constant 0 : index
    %c0_29 = arith.constant 0 : index
    %55 = vector.load %arg2[%c5, %c0_28, %c0_29] : memref<6x256x256xbf16, #tpu.memory_space<vmem>>, vector<1x256x128xbf16>
    %56 = vector.shape_cast %55 : vector<1x256x128xbf16> to vector<256x128xbf16>
    %cst_30 = arith.constant dense<0.000000e+00> : vector<8x128xf32>
    %57 = tpu.matmul %54, %56, %cst_30 {dimension_numbers = #tpu.dot_dimension_numbers<[1], [0], [0], [1], [0, 0, 1, 1], [], []>} : vector<8x256xbf16>, vector<256x128xbf16>, vector<8x128xf32> -> vector<8x128xf32>
    %c0_31 = arith.constant 0 : index
    %c768 = arith.constant 768 : index
    %58 = vector.load %arg3[%c0_31, %c768] : memref<1x896xf32, #tpu.memory_space<vmem>>, vector<1x128xf32>
    %59 = vector.broadcast %58 : vector<1x128xf32> to vector<8x128xf32>
    %60 = arith.addf %57, %59 : vector<8x128xf32>
    %c0_32 = arith.constant 0 : index
    %c0_33 = arith.constant 0 : index
    %61 = vector.load %arg4[%c0_32, %c0_33] : memref<8x128xf32, #tpu.memory_space<vmem>>, vector<8x128xf32>
    tpu.vector_store %arg4[%c0_32, %c0_33], %60 {strides = array<i32>} : memref<8x128xf32, #tpu.memory_space<vmem>>, vector<8x128xf32>,
    return
  }
  func.func @transform_0(%arg0: i32) -> (i32, i32) {
    %c0_i32 = arith.constant 0 : i32
    %c0_i32_0 = arith.constant 0 : i32
    return %arg0, %c0_i32 : i32, i32
  }
  func.func @transform_1(%arg0: i32) -> (i32, i32, i32) {
    %c0_i32 = arith.constant 0 : i32
    %c0_i32_0 = arith.constant 0 : i32
    %c0_i32_1 = arith.constant 0 : i32
    %c0_i32_2 = arith.constant 0 : i32
    return %c0_i32, %c0_i32_0, %c0_i32_1 : i32, i32, i32
  }
  func.func @transform_2(%arg0: i32) -> (i32, i32) {
    %c0_i32 = arith.constant 0 : i32
    %c0_i32_0 = arith.constant 0 : i32
    %c0_i32_1 = arith.constant 0 : i32
    return %c0_i32, %c0_i32_0 : i32, i32
  }
  func.func @transform_3(%arg0: i32) -> (i32, i32) {
    %c0_i32 = arith.constant 0 : i32
    %c0_i32_0 = arith.constant 0 : i32
    return %arg0, %c0_i32 : i32, i32
  }
}

module attributes {stable_mosaic.version = 11 : i64} {
  func.func @_qn_kernel(%arg0: i32, %arg1: memref<8x16xf32, #tpu.memory_space<vmem>>, %arg2: memref<6x256x256xbf16, #tpu.memory_space<vmem>>, %arg3: memref<1x896xf32, #tpu.memory_space<vmem>>, %arg4: memref<8x128xf32, #tpu.memory_space<vmem>>) attributes {dimension_semantics = [#tpu.dimension_semantics<parallel>], iteration_bounds = array<i64: 1>, scalar_prefetch = 0 : i64, scratch_operands = 0 : i64, tpu.core_type = #tpu.core_type<tc>, window_params = [{transform_indices = @transform_0, window_bounds = array<i64: 8, 16>}, {pipeline_mode = #tpu.pipeline_mode<synchronous>, transform_indices = @transform_1, window_bounds = array<i64: 6, 256, 256>}, {pipeline_mode = #tpu.pipeline_mode<synchronous>, transform_indices = @transform_2, window_bounds = array<i64: 1, 896>}, {transform_indices = @transform_3, window_bounds = array<i64: 8, 128>}]} {
    %c0 = arith.constant 0 : index
    %c0_0 = arith.constant 0 : index
    %0 = vector.load %arg1[%c0, %c0_0] : memref<8x16xf32, #tpu.memory_space<vmem>>, vector<8x16xf32>
    %1 = arith.truncf %0 : vector<8x16xf32> to vector<8x16xbf16>
    %c0_1 = arith.constant 0 : index
    %c0_2 = arith.constant 0 : index
    %c0_3 = arith.constant 0 : index
    %2 = vector.load %arg2[%c0_1, %c0_2, %c0_3] : memref<6x256x256xbf16, #tpu.memory_space<vmem>>, vector<1x16x128xbf16>
    %3 = vector.shape_cast %2 : vector<1x16x128xbf16> to vector<16x128xbf16>
    %cst = arith.constant dense<0.000000e+00> : vector<8x128xf32>
    %4 = tpu.matmul %1, %3, %cst {dimension_numbers = #tpu.dot_dimension_numbers<[1], [0], [0], [1], [0, 0, 1, 1], [], []>} : vector<8x16xbf16>, vector<16x128xbf16>, vector<8x128xf32> -> vector<8x128xf32>
    %c0_4 = arith.constant 0 : index
    %c0_5 = arith.constant 0 : index
    %5 = vector.load %arg3[%c0_4, %c0_5] : memref<1x896xf32, #tpu.memory_space<vmem>>, vector<1x128xf32>
    %6 = vector.broadcast %5 : vector<1x128xf32> to vector<8x128xf32>
    %7 = arith.addf %4, %6 : vector<8x128xf32>
    %cst_6 = arith.constant 0.00999999977 : f32
    %8 = vector.broadcast %cst_6 : f32 to vector<8x128xf32>
    %9 = arith.mulf %8, %7 : vector<8x128xf32>
    %10 = arith.maximumf %7, %9 : vector<8x128xf32>
    %11 = arith.truncf %10 : vector<8x128xf32> to vector<8x128xbf16>
    %c1 = arith.constant 1 : index
    %c0_7 = arith.constant 0 : index
    %c0_8 = arith.constant 0 : index
    %12 = vector.load %arg2[%c1, %c0_7, %c0_8] : memref<6x256x256xbf16, #tpu.memory_space<vmem>>, vector<1x128x128xbf16>
    %13 = vector.shape_cast %12 : vector<1x128x128xbf16> to vector<128x128xbf16>
    %cst_9 = arith.constant dense<0.000000e+00> : vector<8x128xf32>
    %14 = tpu.matmul %11, %13, %cst_9 {dimension_numbers = #tpu.dot_dimension_numbers<[1], [0], [0], [1], [0, 0, 1, 1], [], []>} : vector<8x128xbf16>, vector<128x128xbf16>, vector<8x128xf32> -> vector<8x128xf32>
    %c0_10 = arith.constant 0 : index
    %c128 = arith.constant 128 : index
    %15 = vector.load %arg3[%c0_10, %c128] : memref<1x896xf32, #tpu.memory_space<vmem>>, vector<1x128xf32>
    %16 = vector.broadcast %15 : vector<1x128xf32> to vector<8x128xf32>
    %17 = arith.addf %14, %16 : vector<8x128xf32>
    %cst_11 = arith.constant 0.00999999977 : f32
    %18 = vector.broadcast %cst_11 : f32 to vector<8x128xf32>
    %19 = arith.mulf %18, %17 : vector<8x128xf32>
    %20 = arith.maximumf %17, %19 : vector<8x128xf32>
    %21 = arith.truncf %20 : vector<8x128xf32> to vector<8x128xbf16>
    %c2 = arith.constant 2 : index
    %c0_12 = arith.constant 0 : index
    %c0_13 = arith.constant 0 : index
    %22 = vector.load %arg2[%c2, %c0_12, %c0_13] : memref<6x256x256xbf16, #tpu.memory_space<vmem>>, vector<1x128x128xbf16>
    %23 = vector.shape_cast %22 : vector<1x128x128xbf16> to vector<128x128xbf16>
    %cst_14 = arith.constant dense<0.000000e+00> : vector<8x128xf32>
    %24 = tpu.matmul %21, %23, %cst_14 {dimension_numbers = #tpu.dot_dimension_numbers<[1], [0], [0], [1], [0, 0, 1, 1], [], []>} : vector<8x128xbf16>, vector<128x128xbf16>, vector<8x128xf32> -> vector<8x128xf32>
    %c0_15 = arith.constant 0 : index
    %c256 = arith.constant 256 : index
    %25 = vector.load %arg3[%c0_15, %c256] : memref<1x896xf32, #tpu.memory_space<vmem>>, vector<1x128xf32>
    %26 = vector.broadcast %25 : vector<1x128xf32> to vector<8x128xf32>
    %27 = arith.addf %24, %26 : vector<8x128xf32>
    %cst_16 = arith.constant 0.000000e+00 : f32
    %28 = vector.broadcast %cst_16 : f32 to vector<8x128xf32>
    %29 = arith.subf %28, %27 : vector<8x128xf32>
    %30 = math.exp %29 : vector<8x128xf32>
    %cst_17 = arith.constant 1.000000e+00 : f32
    %31 = vector.broadcast %cst_17 : f32 to vector<8x128xf32>
    %32 = arith.addf %31, %30 : vector<8x128xf32>
    %33 = tpu.reciprocal %32 {approx = true} : vector<8x128xf32> -> vector<8x128xf32>
    %34 = arith.truncf %33 : vector<8x128xf32> to vector<8x128xbf16>
    %c3 = arith.constant 3 : index
    %c0_18 = arith.constant 0 : index
    %c0_19 = arith.constant 0 : index
    %35 = vector.load %arg2[%c3, %c0_18, %c0_19] : memref<6x256x256xbf16, #tpu.memory_space<vmem>>, vector<1x128x128xbf16>
    %36 = vector.shape_cast %35 : vector<1x128x128xbf16> to vector<128x128xbf16>
    %cst_20 = arith.constant dense<0.000000e+00> : vector<8x128xf32>
    %37 = tpu.matmul %34, %36, %cst_20 {dimension_numbers = #tpu.dot_dimension_numbers<[1], [0], [0], [1], [0, 0, 1, 1], [], []>} : vector<8x128xbf16>, vector<128x128xbf16>, vector<8x128xf32> -> vector<8x128xf32>
    %c0_21 = arith.constant 0 : index
    %c384 = arith.constant 384 : index
    %38 = vector.load %arg3[%c0_21, %c384] : memref<1x896xf32, #tpu.memory_space<vmem>>, vector<1x128xf32>
    %39 = vector.broadcast %38 : vector<1x128xf32> to vector<8x128xf32>
    %40 = arith.addf %37, %39 : vector<8x128xf32>
    %cst_22 = arith.constant 0.00999999977 : f32
    %41 = vector.broadcast %cst_22 : f32 to vector<8x128xf32>
    %42 = arith.mulf %41, %40 : vector<8x128xf32>
    %43 = arith.maximumf %40, %42 : vector<8x128xf32>
    %44 = arith.truncf %43 : vector<8x128xf32> to vector<8x128xbf16>
    %c4 = arith.constant 4 : index
    %c0_23 = arith.constant 0 : index
    %c0_24 = arith.constant 0 : index
    %45 = vector.load %arg2[%c4, %c0_23, %c0_24] : memref<6x256x256xbf16, #tpu.memory_space<vmem>>, vector<1x128x256xbf16>
    %46 = vector.shape_cast %45 : vector<1x128x256xbf16> to vector<128x256xbf16>
    %cst_25 = arith.constant dense<0.000000e+00> : vector<8x256xf32>
    %47 = tpu.matmul %44, %46, %cst_25 {dimension_numbers = #tpu.dot_dimension_numbers<[1], [0], [0], [1], [0, 0, 1, 1], [], []>} : vector<8x128xbf16>, vector<128x256xbf16>, vector<8x256xf32> -> vector<8x256xf32>
    %c0_26 = arith.constant 0 : index
    %c512 = arith.constant 512 : index
    %48 = vector.load %arg3[%c0_26, %c512] : memref<1x896xf32, #tpu.memory_space<vmem>>, vector<1x256xf32>
    %49 = vector.broadcast %48 : vector<1x256xf32> to vector<8x256xf32>
    %50 = arith.addf %47, %49 : vector<8x256xf32>
    %cst_27 = arith.constant 0.00999999977 : f32
    %51 = vector.broadcast %cst_27 : f32 to vector<8x256xf32>
    %52 = arith.mulf %51, %50 : vector<8x256xf32>
    %53 = arith.maximumf %50, %52 : vector<8x256xf32>
    %54 = arith.truncf %53 : vector<8x256xf32> to vector<8x256xbf16>
    %c5 = arith.constant 5 : index
    %c0_28 = arith.constant 0 : index
    %c0_29 = arith.constant 0 : index
    %55 = vector.load %arg2[%c5, %c0_28, %c0_29] : memref<6x256x256xbf16, #tpu.memory_space<vmem>>, vector<1x256x128xbf16>
    %56 = vector.shape_cast %55 : vector<1x256x128xbf16> to vector<256x128xbf16>
    %cst_30 = arith.constant dense<0.000000e+00> : vector<8x128xf32>
    %57 = tpu.matmul %54, %56, %cst_30 {dimension_numbers = #tpu.dot_dimension_numbers<[1], [0], [0], [1], [0, 0, 1, 1], [], []>} : vector<8x256xbf16>, vector<256x128xbf16>, vector<8x128xf32> -> vector<8x128xf32>
    %c0_31 = arith.constant 0 : index
    %c768 = arith.constant 768 : index
    %58 = vector.load %arg3[%c0_31, %c768] : memref<1x896xf32, #tpu.memory_space<vmem>>, vector<1x128xf32>
    %59 = vector.broadcast %58 : vector<1x128xf32> to vector<8x128xf32>
    %60 = arith.addf %57, %59 : vector<8x128xf32>
    %c0_32 = arith.constant 0 : index
    %c0_33 = arith.constant 0 : index
    %61 = vector.load %arg4[%c0_32, %c0_33] : memref<8x128xf32, #tpu.memory_space<vmem>>, vector<8x128xf32>
    tpu.vector_store %arg4[%c0_32, %c0_33], %60 {strides = array<i32>} : memref<8x128xf32, #tpu.memory_space<vmem>>, vector<8x128xf32>,
    return
  }
  func.func @transform_0(%arg0: i32) -> (i32, i32) {
    %c0_i32 = arith.constant 0 : i32
    %c0_i32_0 = arith.constant 0 : i32
    return %arg0, %c0_i32 : i32, i32
  }
  func.func @transform_1(%arg0: i32) -> (i32, i32, i32) {
    %c0_i32 = arith.constant 0 : i32
    %c0_i32_0 = arith.constant 0 : i32
    %c0_i32_1 = arith.constant 0 : i32
    %c0_i32_2 = arith.constant 0 : i32
    return %c0_i32, %c0_i32_0, %c0_i32_1 : i32, i32, i32
  }
  func.func @transform_2(%arg0: i32) -> (i32, i32) {
    %c0_i32 = arith.constant 0 : i32
    %c0_i32_0 = arith.constant 0 : i32
    %c0_i32_1 = arith.constant 0 : i32
    return %c0_i32, %c0_i32_0 : i32, i32
  }
  func.func @transform_3(%arg0: i32) -> (i32, i32) {
    %c0_i32 = arith.constant 0 : i32
    %c0_i32_0 = arith.constant 0 : i32
    return %arg0, %c0_i32 : i32, i32
  }
}

</mosaic_0001>

<bundles_post_ra>
// kernel: tpu_custom_call.1
= control target key start
LH: loop header
LB: loop body
LE: loop exit
PB: predicated region body
PF: predicated region fallthrough
CT: control target
= control target key end

     0   :  { %8 = vsyncpa [#allocation3], 0  ;;  %s1105_s0 = inlined_call_operand.hbm [shape: f32[8,16], index: 0, kind: input, shape index: {}]   ;;  %s1106_s1 = inlined_call_operand.hbm [shape: bf16[6,256,256], index: 1, kind: input, shape index: {}]   ;;  %s1107_s2 = inlined_call_operand.hbm [shape: f32[1,896], index: 2, kind: input, shape index: {}]   ;;  %s1108_s3 = inlined_call_operand.hbm [shape: f32[8,128], index: 3, kind: output, shape index: {}]  }
   0x1   :  { %9 = vsyncpa [#allocation6], 0  ;;  %s26_s14 = sshll.u32 %s1106_s1, 4  ;;  %s27_s14 = int_to_ptr.hbm [resolvable:$true] %s26_s14 }
   0x2   :  { %10 = vsyncpa [#allocation4], 0  ;;  %s1067_s15 = smov [#allocation5]   ;;  %s16_s19 = sshll.u32 %s1105_s0, 4  ;;  %s17_s19 = int_to_ptr.hbm [resolvable:$true] %s16_s19 }
   0x3   :  { %s28_s16 = sshll.u32 %s1067_s15, 4  ;;  %s1068_s20 = smov 128   ;;  %s29_s16 = int_to_ptr.vmem [resolvable:$true] %s28_s16 }
   0x4   :  { %s1069_s21 = smov 8   ;;  %s1070_s22 = smov [#allocation2]  }
   0x5   :  { %34 = dma.hbm_to_vmem [thread:$0]  %s27_s14, 24576, %s29_s16, [#allocation6], %s1068_s20, %s1068_s20, %s1069_s21  }
   0x6   :  { %s18_s23 = sshll.u32 %s1070_s22, 4  ;;  %s40_s26 = sshll.u32 %s1107_s2, 4  ;;  %s19_s23 = int_to_ptr.vmem [resolvable:$true] %s18_s23  ;;  %s41_s26 = int_to_ptr.hbm [resolvable:$true] %s40_s26 }
   0x7   :  { %21 = dma.hbm_to_vmem [thread:$0]  %s17_s19, 128, %s19_s23, [#allocation3]  }
   0x8   :  { %s1071_s1 = smov [#allocation7]  }
   0x9   :  { %s42_s27 = sshll.u32 %s1071_s1, 4  ;;  %s43_s27 = int_to_ptr.vmem [resolvable:$true] %s42_s27 }
   0xa   :  { %45 = dma.hbm_to_vmem [thread:$0]  %s41_s26, 112, %s43_s27, [#allocation6]  }
   0xb   :  { %1061 = dma.done.wait [#allocation3], 128  }
   0xc   :  { %1062 = vsyncadd [#allocation3], 4294967168 }
   0xd   :  { %1063 = dma.done.wait [#allocation6], 24688  }
   0xe   :  { %1064 = vsyncadd [#allocation6], 4294942608  ;;  %v666_v0 = vld [vmem:[#allocation5] sm:$0xf]  ;;  %v893_v1 = vld [vmem:[#allocation5 + $0x4] sm:$0xf0] }
   0xf   :  { %v59_v2 = vld [vmem:[#allocation2] sm:$0xff]  ;;  %v667_v3 = vor.u32 %v893_v1, %v666_v0  ;;  %v699_v4 = vld [vmem:[#allocation5 + $0x170] sm:$0xf]  ;;  %v695_v6 = vld [vmem:[#allocation5 + $0x160] sm:$0xf]  ;;  %vm73_vm0 = vcmask 130048  }
  0x10   :  { %v901_v5 = vld [vmem:[#allocation5 + $0x174] sm:$0xf0]  ;;  %v60_v7 = vpack.c.bf16 %v59_v2, %v59_v2  ;;  %v900_v9 = vld [vmem:[#allocation5 + $0x164] sm:$0xf0]  ;;  %v691_v11 = vld [vmem:[#allocation5 + $0x150] sm:$0xf] }
  0x11   :  { %v700_v8 = vor.u32 %v901_v5, %v699_v4  ;;  %84 = vmatpush.bf16.msra.mxu0 %v667_v3  ;;  %v696_v10 = vor.u32 %v900_v9, %v695_v6  ;;  %v899_v12 = vld [vmem:[#allocation5 + $0x154] sm:$0xf0]  ;;  %v687_v14 = vld [vmem:[#allocation5 + $0x140] sm:$0xf]  ;;  %v898_v15 = vld [vmem:[#allocation5 + $0x144] sm:$0xf0] }
  0x12   :  { %v692_v13 = vor.u32 %v899_v12, %v691_v11  ;;  %v688_v16 = vor.u32 %v898_v15, %v687_v14  ;;  %v683_v17 = vld [vmem:[#allocation5 + $0x130] sm:$0xf]  ;;  %v897_v18 = vld [vmem:[#allocation5 + $0x134] sm:$0xf0]  ;;  %v679_v20 = vld [vmem:[#allocation5 + $0x120] sm:$0xf] }
  0x13   :  { %162 = vmatpush.bf16.msra.mxu1 %v700_v8  ;;  %v684_v19 = vor.u32 %v897_v18, %v683_v17  ;;  %v896_v21 = vld [vmem:[#allocation5 + $0x124] sm:$0xf0]  ;;  %v675_v23 = vld [vmem:[#allocation5 + $0x110] sm:$0xf]  ;;  %v895_v24 = vld [vmem:[#allocation5 + $0x114] sm:$0xf0] }
  0x14   :  { %668 = vmatmul.msk.bf16.vlgmr.msra.gmra.mxu0 %vm73_vm0, %v60_v7  ;;  %v680_v22 = vor.u32 %v896_v21, %v679_v20  ;;  %v676_v25 = vor.u32 %v895_v24, %v675_v23  ;;  %v671_v26 = vld [vmem:[#allocation5 + $0x100] sm:$0xf]  ;;  %v894_v27 = vld [vmem:[#allocation5 + $0x104] sm:$0xf0]  ;;  %v731_v29 = vld [vmem:[#allocation5 + $0x270] sm:$0xf] }
  0x15   :  { %v672_v28 = vor.u32 %v894_v27, %v671_v26  ;;  %v909_v30 = vld [vmem:[#allocation5 + $0x274] sm:$0xf0]  ;;  %v727_v31 = vld [vmem:[#allocation5 + $0x260] sm:$0xf]  ;;  %v908_v33 = vld [vmem:[#allocation5 + $0x264] sm:$0xf0] }
  0x16   :  { %v732_v32 = vor.u32 %v909_v30, %v731_v29  ;;  %v728_v34 = vor.u32 %v908_v33, %v727_v31  ;;  %v723_v35 = vld [vmem:[#allocation5 + $0x250] sm:$0xf]  ;;  %v907_v36 = vld [vmem:[#allocation5 + $0x254] sm:$0xf0]  ;;  %v719_v38 = vld [vmem:[#allocation5 + $0x240] sm:$0xf] }
  0x17   :  { %163 = vmatpush.bf16.msra.mxu1 %v696_v10  ;;  %v724_v37 = vor.u32 %v907_v36, %v723_v35  ;;  %v906_v39 = vld [vmem:[#allocation5 + $0x244] sm:$0xf0]  ;;  %v715_v41 = vld [vmem:[#allocation5 + $0x230] sm:$0xf]  ;;  %v905_v42 = vld [vmem:[#allocation5 + $0x234] sm:$0xf0] }
  0x18   :  { %247 = vmatpush.bf16.msra.mxu2 %v732_v32  ;;  %v720_v40 = vor.u32 %v906_v39, %v719_v38  ;;  %v716_v43 = vor.u32 %v905_v42, %v715_v41  ;;  %v711_v44 = vld [vmem:[#allocation5 + $0x220] sm:$0xf]  ;;  %v904_v45 = vld [vmem:[#allocation5 + $0x224] sm:$0xf0]  ;;  %v707_v54 = vld [vmem:[#allocation5 + $0x210] sm:$0xf] }
  0x19   :  { %v712_v46 = vor.u32 %v904_v45, %v711_v44  ;;  %v956_v47 = vld [vmem:[#allocation7] ss:$0 sm:$0xff]  ;;  %v903_v55 = vld [vmem:[#allocation5 + $0x214] sm:$0xf0]  ;;  %v902_v58 = vld [vmem:[#allocation5 + $0x204] sm:$0xf0] }
  0x1a   :  { %v708_v56 = vor.u32 %v903_v55, %v707_v54  ;;  %v703_v57 = vld [vmem:[#allocation5 + $0x200] sm:$0xf]  ;;  %v763_v60 = vld [vmem:[#allocation5 + $0x370] sm:$0xf]  ;;  %v917_v61 = vld [vmem:[#allocation5 + $0x374] sm:$0xf0] }
  0x1b   :  { %164 = vmatpush.bf16.msra.mxu1 %v692_v13  ;;  %v704_v59 = vor.u32 %v902_v58, %v703_v57  ;;  %v759_v62 = vld [vmem:[#allocation5 + $0x360] sm:$0xf]  ;;  %v764_v63 = vor.u32 %v917_v61, %v763_v60  ;;  %v916_v0 = vld [vmem:[#allocation5 + $0x364] sm:$0xf0]  ;;  %v755_v9 = vld [vmem:[#allocation5 + $0x350] sm:$0xf] }
  0x1c   :  { %248 = vmatpush.bf16.msra.mxu2 %v728_v34  ;;  %v760_v1 = vor.u32 %v916_v0, %v759_v62  ;;  %v957_v2 = vld [vmem:[#allocation7 + $0x1] ss:$0 sm:$0xff]  ;;  %v915_v10 = vld [vmem:[#allocation5 + $0x354] sm:$0xf0]  ;;  %v914_v13 = vld [vmem:[#allocation5 + $0x344] sm:$0xf0] }
  0x1d   :  { %335 = vmatpush.bf16.msra.mxu3 %v764_v63  ;;  %v756_v11 = vor.u32 %v915_v10, %v755_v9  ;;  %v751_v12 = vld [vmem:[#allocation5 + $0x340] sm:$0xf]  ;;  %v747_v15 = vld [vmem:[#allocation5 + $0x330] sm:$0xf]  ;;  %v932_v29 = vld [vmem:[#allocation5 + $0x474] sm:$0xf] }
  0x1e   :  { %v752_v14 = vor.u32 %v914_v13, %v751_v12  ;;  %v743_v18 = vld [vmem:[#allocation5 + $0x320] sm:$0xf]  ;;  %v739_v21 = vld [vmem:[#allocation5 + $0x310] sm:$0xf]  ;;  %v825_v31 = vld [vmem:[#allocation5 + $0x478] sm:$0xf0] }
  0x1f   :  { %165 = vmatpush.bf16.msra.mxu1 %v688_v16  ;;  %v913_v16 = vld [vmem:[#allocation5 + $0x334] sm:$0xf0]  ;;  %v735_v24 = vld [vmem:[#allocation5 + $0x300] sm:$0xf]  ;;  %v823_v27 = vld [vmem:[#allocation5 + $0x470] sm:$0xf]  ;;  %v828_v34 = vor.u32 %v932_v29, %v825_v31 }
  0x20   :  { %249 = vmatpush.bf16.msra.mxu2 %v724_v37  ;;  %v748_v17 = vor.u32 %v913_v16, %v747_v15  ;;  %v815_v32 = vld [vmem:[#allocation5 + $0x460] sm:$0xf]  ;;  %v931_v33 = vld [vmem:[#allocation5 + $0x464] sm:$0xf0]  ;;  %v930_v35 = vld [vmem:[#allocation5 + $0x464] sm:$0xf] }
  0x21   :  { %336 = vmatpush.bf16.msra.mxu3 %v760_v1  ;;  %v817_v36 = vld [vmem:[#allocation5 + $0x468] sm:$0xf0]  ;;  %v816_v37 = vor.u32 %v931_v33, %v815_v32  ;;  %v958_v38 = vld [vmem:[#allocation7 + $0x2] ss:$0 sm:$0xff]  ;;  %v929_v41 = vld [vmem:[#allocation5 + $0x454] sm:$0xf0] }
  0x22   :  { %v820_v39 = vor.u32 %v930_v35, %v817_v36  ;;  %v928_v42 = vld [vmem:[#allocation5 + $0x454] sm:$0xf]  ;;  %v925_v57 = vld [vmem:[#allocation5 + $0x434] sm:$0xf0]  ;;  %v783_v63 = vld [vmem:[#allocation5 + $0x420] sm:$0xf] }
  0x23   :  { %166 = vmatpush.bf16.msra.mxu1 %v684_v19  ;;  %v912_v19 = vld [vmem:[#allocation5 + $0x324] sm:$0xf0]  ;;  %v924_v58 = vld [vmem:[#allocation5 + $0x434] sm:$0xf]  ;;  %v922_v1 = vld [vmem:[#allocation5 + $0x424] sm:$0xf] }
  0x24   :  { %250 = vmatpush.bf16.msra.mxu2 %v720_v40  ;;  %v744_v20 = vor.u32 %v912_v19, %v743_v18  ;;  %v807_v40 = vld [vmem:[#allocation5 + $0x450] sm:$0xf]  ;;  %v923_v0 = vld [vmem:[#allocation5 + $0x424] sm:$0xf0]  ;;  %v921_v10 = vld [vmem:[#allocation5 + $0x414] sm:$0xf0] }
  0x25   :  { %337 = vmatpush.bf16.msra.mxu3 %v756_v11  ;;  %v808_v45 = vor.u32 %v929_v41, %v807_v40  ;;  %v775_v9 = vld [vmem:[#allocation5 + $0x410] sm:$0xf]  ;;  %v920_v11 = vld [vmem:[#allocation5 + $0x414] sm:$0xf]  ;;  %v777_v13 = vld [vmem:[#allocation5 + $0x418] sm:$0xf0] }
  0x26   :  { %v776_v12 = vor.u32 %v921_v10, %v775_v9  ;;  %v767_v15 = vld [vmem:[#allocation5 + $0x400] sm:$0xf]  ;;  %v919_v16 = vld [vmem:[#allocation5 + $0x404] sm:$0xf0]  ;;  %v769_v19 = vld [vmem:[#allocation5 + $0x408] sm:$0xf0] }
  0x27   :  { %167 = vmatpush.bf16.msra.mxu1 %v680_v22  ;;  %v911_v22 = vld [vmem:[#allocation5 + $0x314] sm:$0xf0]  ;;  %v768_v18 = vor.u32 %v919_v16, %v767_v15  ;;  %v887_v29 = vld [vmem:[#allocation5 + $0x5e0] sm:$0xf]  ;;  %v851_v33 = vld [vmem:[#allocation5 + $0x550] sm:$0xf] }
  0x28   :  { %251 = vmatpush.bf16.msra.mxu2 %v716_v43  ;;  %v740_v23 = vor.u32 %v911_v22, %v739_v21  ;;  %v809_v43 = vld [vmem:[#allocation5 + $0x458] sm:$0xf0]  ;;  %v859_v21 = vld [vmem:[#allocation5 + $0x570] sm:$0xf]  ;;  %v941_v22 = vld [vmem:[#allocation5 + $0x574] sm:$0xf0] }
  0x29   :  { %338 = vmatpush.bf16.msra.mxu3 %v752_v14  ;;  %v780_v14 = vor.u32 %v920_v11, %v777_v13  ;;  %v883_v35 = vld [vmem:[#allocation5 + $0x5d0] sm:$0xf]  ;;  %v947_v36 = vld [vmem:[#allocation5 + $0x5d4] sm:$0xf0]  ;;  %v938_v40 = vld [vmem:[#allocation5 + $0x544] sm:$0xf0] }
  0x2a   :  { %v879_v41 = vld [vmem:[#allocation5 + $0x5c0] sm:$0xf]  ;;  %v942_v10 = vld [vmem:[#allocation5 + $0x584] sm:$0xf0]  ;;  %s1072_s0 = smov [#allocation8]   ;;  %s653_s30 = sshll.u32 %s1108_s3, 4  ;;  %s654_s30 = int_to_ptr.hbm [resolvable:$true] %s653_s30 }
  0x2b   :  { %168 = vmatpush.bf16.msra.mxu1 %v676_v25  ;;  %v910_v25 = vld [vmem:[#allocation5 + $0x304] sm:$0xf0]  ;;  %s651_s2 = sshll.u32 %s1072_s0, 4  ;;  %s652_s2 = int_to_ptr.vmem [resolvable:$true] %s651_s2 }
  0x2c   :  { %252 = vmatpush.bf16.msra.mxu2 %v712_v46  ;;  %v736_v26 = vor.u32 %v910_v25, %v735_v24  ;;  %v860_v24 = vor.u32 %v941_v22, %v859_v21  ;;  %v949_v25 = vld [vmem:[#allocation5 + $0x5f4] sm:$0xf0] }
  0x2d   :  { %339 = vmatpush.bf16.msra.mxu3 %v748_v17  ;;  %v918_v17 = vld [vmem:[#allocation5 + $0x404] sm:$0xf] }
  0x2f   :  { %169 = vmatpush.bf16.msra.mxu1 %v672_v28  ;;  %v933_v28 = vld [vmem:[#allocation5 + $0x474] sm:$0xf0] }
  0x30   :  { %253 = vmatpush.bf16.msra.mxu2 %v708_v56  ;;  %v824_v30 = vor.u32 %v933_v28, %v823_v27  ;;  %v791_v56 = vld [vmem:[#allocation5 + $0x430] sm:$0xf]  ;;  %v940_v27 = vld [vmem:[#allocation5 + $0x564] sm:$0xf0] }
  0x31   :  { %340 = vmatpush.bf16.msra.mxu3 %v744_v20  ;;  %v792_v61 = vor.u32 %v925_v57, %v791_v56  ;;  %v772_v20 = vor.u32 %v918_v17, %v769_v19  ;;  %v959_v56 = vld [vmem:[#allocation7 + $0x3] ss:$0 sm:$0xff] }
  0x32   :  { %454 = vmatpush.bf16.msrb.mxu0 %v824_v30  ;;  %v948_v30 = vld [vmem:[#allocation5 + $0x5e4] sm:$0xf0] }
  0x33   :  { %467 = vmatpush.bf16.msrb.mxu1 %v828_v34  ;;  %v888_v32 = vor.u32 %v948_v30, %v887_v29  ;;  %v939_v34 = vld [vmem:[#allocation5 + $0x554] sm:$0xf0] }
  0x34   :  { %254 = vmatpush.bf16.msra.mxu2 %v704_v59  ;;  %v793_v59 = vld [vmem:[#allocation5 + $0x438] sm:$0xf0] }
  0x35   :  { %341 = vmatpush.bf16.msra.mxu3 %v740_v23  ;;  %v796_v62 = vor.u32 %v924_v58, %v793_v59  ;;  %v891_v23 = vld [vmem:[#allocation5 + $0x5f0] sm:$0xf] }
  0x36   :  { %455 = vmatpush.bf16.msrb.mxu0 %v816_v37  ;;  %v892_v28 = vor.u32 %v949_v25, %v891_v23  ;;  %v852_v37 = vor.u32 %v939_v34, %v851_v33 }
  0x37   :  { %468 = vmatpush.bf16.msrb.mxu1 %v820_v39  ;;  %v847_v39 = vld [vmem:[#allocation5 + $0x540] sm:$0xf] }
  0x38   :  { %619 = vmatpush.bf16.msrb.mxu2 %v860_v24 }
  0x39   :  { %342 = vmatpush.bf16.msra.mxu3 %v736_v26  ;;  %v855_v26 = vld [vmem:[#allocation5 + $0x560] sm:$0xf] }
  0x3a   :  { %456 = vmatpush.bf16.msrb.mxu0 %v808_v45  ;;  %v856_v31 = vor.u32 %v940_v27, %v855_v26  ;;  %v843_v45 = vld [vmem:[#allocation5 + $0x530] sm:$0xf]  ;;  %v960_v27 = vld [vmem:[#allocation7 + $0x6] ss:$0 sm:$0xff] }
  0x3c   :  { %620 = vmatpush.bf16.msrb.mxu2 %v856_v31 }
  0x3d   :  { %632 = vmatpush.bf16.msrb.mxu3 %v892_v28 }
  0x40   :  { %621 = vmatpush.bf16.msrb.mxu2 %v852_v37 }
  0x41   :  { %633 = vmatpush.bf16.msrb.mxu3 %v888_v32 }
  0x91   :  { %v86_v48 = vpop.f32.mrf.mxu0 }
  0x92   :  { %v87_v49 = vadd.f32 %v956_v47, %v86_v48  ;;  %v812_v47 = vor.u32 %v928_v42, %v809_v43  ;;  %v799_v48 = vld [vmem:[#allocation5 + $0x440] sm:$0xf]  ;;  %v946_v42 = vld [vmem:[#allocation5 + $0x5c4] sm:$0xf0]  ;;  %v848_v43 = vor.u32 %v938_v40, %v847_v39 }
  0x94   :  { %v90_v50 = vmul.f32 0.01, %v87_v49  ;;  %469 = vmatpush.bf16.msrb.mxu1 %v812_v47  ;;  %v875_v47 = vld [vmem:[#allocation5 + $0x5b0] sm:$0xf]  ;;  %622 = vmatpush.bf16.msrb.mxu2 %v848_v43 }
  0x96   :  { %v91_v51 = vmax.f32 %v87_v49, %v90_v50  ;;  %v927_v49 = vld [vmem:[#allocation5 + $0x444] sm:$0xf0]  ;;  %v926_v50 = vld [vmem:[#allocation5 + $0x444] sm:$0xf] }
  0x98   :  { %v92_v52 = vpack.c.bf16 %v91_v51, %v91_v51  ;;  %v801_v51 = vld [vmem:[#allocation5 + $0x448] sm:$0xf0] }
  0x99   :  { %v88_v53 = vpop.f32.mrf.mxu0  ;;  %v804_v55 = vor.u32 %v926_v50, %v801_v51  ;;  %v839_v51 = vld [vmem:[#allocation5 + $0x520] sm:$0xf] }
  0x9a   :  { %170 = vmatmul.bf16.vlgmr.msra.gmra.mxu1 %v92_v52  ;;  %v800_v53 = vor.u32 %v927_v49, %v799_v48  ;;  %v945_v48 = vld [vmem:[#allocation5 + $0x5b4] sm:$0xf0] }
  0x9b   :  { %470 = vmatpush.bf16.msrb.mxu1 %v804_v55  ;;  %v876_v50 = vor.u32 %v945_v48, %v875_v47 }
  0x9c   :  { %457 = vmatpush.bf16.msrb.mxu0 %v800_v53  ;;  %v871_v53 = vld [vmem:[#allocation5 + $0x5a0] sm:$0xf] }
  0x9f   :  { %471 = vmatpush.bf16.msrb.mxu1 %v796_v62 }
  0xa0   :  { %458 = vmatpush.bf16.msrb.mxu0 %v792_v61 }
 0x117   :  { %v171_v3 = vpop.f32.mrf.mxu1 }
 0x118   :  { %v172_v4 = vadd.f32 %v957_v2, %v171_v3  ;;  %v785_v2 = vld [vmem:[#allocation5 + $0x428] sm:$0xf0]  ;;  %v784_v3 = vor.u32 %v923_v0, %v783_v63  ;;  %v835_v0 = vld [vmem:[#allocation5 + $0x510] sm:$0xf] }
 0x11a   :  { %v175_v5 = vmul.f32 0.01, %v172_v4  ;;  %459 = vmatpush.bf16.msrb.mxu0 %v784_v3  ;;  %v867_v3 = vld [vmem:[#allocation5 + $0x590] sm:$0xf] }
 0x11c   :  { %v176_v6 = vmax.f32 %v172_v4, %v175_v5  ;;  %v788_v5 = vor.u32 %v922_v1, %v785_v2  ;;  %v935_v1 = vld [vmem:[#allocation5 + $0x514] sm:$0xf0] }
 0x11d   :  { %v836_v2 = vor.u32 %v935_v1, %v835_v0 }
 0x11e   :  { %v177_v7 = vpack.c.bf16 %v176_v6, %v176_v6  ;;  %472 = vmatpush.bf16.msrb.mxu1 %v788_v5  ;;  %460 = vmatpush.bf16.msrb.mxu0 %v776_v12  ;;  %v368_v12 = vld [vmem:[#allocation7 + $0x4] sm:$0x3] }
 0x11f   :  { %v173_v8 = vpop.f32.mrf.mxu1  ;;  %v370_v13 = vperm.slane %v368_v12, 0 }
 0x120   :  { %255 = vmatmul.bf16.vlgmr.msra.gmra.mxu2 %v177_v7 }
 0x122   :  { %473 = vmatpush.bf16.msrb.mxu1 %v780_v14  ;;  %461 = vmatpush.bf16.msrb.mxu0 %v768_v18  ;;  %v371_v14 = vperm.slane %v368_v12, 1 }
 0x126   :  { %474 = vmatpush.bf16.msrb.mxu1 %v772_v20 }
 0x1a3   :  { %v256_v44 = vpop.f32.mrf.mxu2 }
 0x1a4   :  { %v257_v46 = vadd.f32 %v958_v38, %v256_v44  ;;  %v884_v38 = vor.u32 %v947_v36, %v883_v35  ;;  %v880_v44 = vor.u32 %v946_v42, %v879_v41 }
 0x1a6   :  { %v260_v52 = vsub.f32 0.0, %v257_v46  ;;  %634 = vmatpush.bf16.msrb.mxu3 %v884_v38  ;;  %v937_v46 = vld [vmem:[#allocation5 + $0x534] sm:$0xf0] }
 0x1a7   :  { %v844_v49 = vor.u32 %v937_v46, %v843_v45 }
 0x1a8   :  { %v261_v54 = vmul.f32 1.442695, %v260_v52  ;;  %v936_v52 = vld [vmem:[#allocation5 + $0x524] sm:$0xf0] }
 0x1a9   :  { %623 = vmatpush.bf16.msrb.mxu2 %v844_v49  ;;  %v840_v55 = vor.u32 %v936_v52, %v839_v51 }
 0x1aa   :  { %961 = vpow2.f32 %v261_v54  ;;  %635 = vmatpush.bf16.msrb.mxu3 %v880_v44  ;;  %v944_v54 = vld [vmem:[#allocation5 + $0x5a4] sm:$0xf0] }
 0x1ab   :  { %v258_v60 = vpop.f32.mrf.mxu2  ;;  %v872_v57 = vor.u32 %v944_v54, %v871_v53 }
 0x1ad   :  { %624 = vmatpush.bf16.msrb.mxu2 %v840_v55 }
 0x1ae   :  { %636 = vmatpush.bf16.msrb.mxu3 %v876_v50 }
 0x1b0   :  { %v962_v4 = vpop.eup %961 }
 0x1b1   :  { %v263_v6 = vadd.f32 1.0, %v962_v4  ;;  %v943_v4 = vld [vmem:[#allocation5 + $0x594] sm:$0xf0]  ;;  %625 = vmatpush.bf16.msrb.mxu2 %v836_v2 }
 0x1b2   :  { %637 = vmatpush.bf16.msrb.mxu3 %v872_v57  ;;  %v868_v5 = vor.u32 %v943_v4, %v867_v3 }
 0x1b3   :  { %963 = vrcp.f32 %v263_v6  ;;  %v831_v6 = vld [vmem:[#allocation5 + $0x500] sm:$0xf] }
 0x1b6   :  { %638 = vmatpush.bf16.msrb.mxu3 %v868_v5 }
 0x1b9   :  { %v964_v7 = vpop.eup %963 }
 0x1ba   :  { %v265_v8 = vpack.c.bf16 %v964_v7, %v964_v7  ;;  %v934_v7 = vld [vmem:[#allocation5 + $0x504] sm:$0xf0] }
 0x1bb   :  { %v832_v9 = vor.u32 %v934_v7, %v831_v6 }
 0x1bc   :  { %343 = vmatmul.bf16.vlgmr.msra.gmra.mxu3 %v265_v8  ;;  %v863_v8 = vld [vmem:[#allocation5 + $0x580] sm:$0xf] }
 0x1bd   :  { %v864_v11 = vor.u32 %v942_v10, %v863_v8  ;;  %626 = vmatpush.bf16.msrb.mxu2 %v832_v9 }
 0x1bf   :  { %639 = vmatpush.bf16.msrb.mxu3 %v864_v11 }
 0x23f   :  { %v344_v58 = vpop.f32.mrf.mxu3 }
 0x240   :  { %v345_v59 = vadd.f32 %v959_v56, %v344_v58 }
 0x242   :  { %v348_v60 = vmul.f32 0.01, %v345_v59 }
 0x244   :  { %v349_v61 = vmax.f32 %v345_v59, %v348_v60 }
 0x246   :  { %v350_v62 = vpack.c.bf16 %v349_v61, %v349_v61 }
 0x247   :  { %v346_v63 = vpop.f32.mrf.mxu3 }
 0x248   :  { %462 = vmatmul.bf16.vlgmr.msrb.gmra.mxu0 %v350_v62  ;;  %475 = vmatmul.bf16.vlgmr.msrb.gmra.mxu1 %v350_v62 }
 0x2c5   :  { %v463_v15 = vpop.f32.mrf.mxu0  ;;  %v476_v16 = vpop.f32.mrf.mxu1 }
 0x2c6   :  { %v464_v17 = vadd.f32 %v463_v15, %v370_v13  ;;  %v477_v18 = vadd.f32 %v476_v16, %v371_v14 }
 0x2c8   :  { %v480_v19 = vmul.f32 0.01, %v464_v17  ;;  %v481_v20 = vmul.f32 0.01, %v477_v18 }
 0x2ca   :  { %v482_v21 = vmax.f32 %v464_v17, %v480_v19  ;;  %v483_v22 = vmax.f32 %v477_v18, %v481_v20 }
 0x2cc   :  { %v484_v23 = vpack.c.bf16 %v482_v21, %v482_v21  ;;  %v485_v24 = vpack.c.bf16 %v483_v22, %v483_v22 }
 0x2cd   :  { %v465_v25 = vpop.f32.mrf.mxu0  ;;  %v478_v26 = vpop.f32.mrf.mxu1 }
 0x2ce   :  { %627 = vmatmul.bf16.vlgmr.msrb.gmra.mxu2 %v484_v23  ;;  %640 = vmatmul.bf16.vlgmr.msrb.gmra.mxu3 %v485_v24 }
 0x351   :  { %v628_v28 = vpop.f32.mrf.mxu2  ;;  %v641_v29 = vpop.f32.mrf.mxu3 }
 0x352   :  { %v629_v30 = vadd.f32 %v960_v27, %v628_v28 }
 0x354   :  { %v642_v31 = vadd.f32 %v641_v29, %v629_v30 }
 0x356   :  { %645 = vst [vmem:[#allocation8] sm:$0xff] %v642_v31 }
 0x357   :  { %656 = dma.vmem_to_hbm [thread:$0]  %s652_s2, 128, %s654_s30, [#allocation4]  }
 0x359   :  { %v630_v32 = vpop.f32.mrf.mxu2  ;;  %v643_v33 = vpop.f32.mrf.mxu3 }
 0x35a   :  { %1065 = dma.done.wait [#allocation4], 128  }
 0x35b   :  { %1066 = vsyncadd [#allocation4], 4294967168 }
 0x35c   :  { %661 = vsyncpa [#allocation3], 1 }
 0x35d   :  { %662 = vsyncpa [#allocation6], 1 }
 0x35e   :  { %663 = vsyncpa [#allocation4], 1 }

// kernel: tpu_custom_call.1
= control target key start
LH: loop header
LB: loop body
LE: loop exit
PB: predicated region body
PF: predicated region fallthrough
CT: control target
= control target key end

     0   :  { %8 = vsyncpa [#allocation3], 0  ;;  %s1105_s0 = inlined_call_operand.hbm [shape: f32[8,16], index: 0, kind: input, shape index: {}]   ;;  %s1106_s1 = inlined_call_operand.hbm [shape: bf16[6,256,256], index: 1, kind: input, shape index: {}]   ;;  %s1107_s2 = inlined_call_operand.hbm [shape: f32[1,896], index: 2, kind: input, shape index: {}]   ;;  %s1108_s3 = inlined_call_operand.hbm [shape: f32[8,128], index: 3, kind: output, shape index: {}]  }
   0x1   :  { %9 = vsyncpa [#allocation6], 0  ;;  %s26_s14 = sshll.u32 %s1106_s1, 4  ;;  %s27_s14 = int_to_ptr.hbm [resolvable:$true] %s26_s14 }
   0x2   :  { %10 = vsyncpa [#allocation4], 0  ;;  %s1067_s15 = smov [#allocation5]   ;;  %s16_s19 = sshll.u32 %s1105_s0, 4  ;;  %s17_s19 = int_to_ptr.hbm [resolvable:$true] %s16_s19 }
   0x3   :  { %s28_s16 = sshll.u32 %s1067_s15, 4  ;;  %s1068_s20 = smov 128   ;;  %s29_s16 = int_to_ptr.vmem [resolvable:$true] %s28_s16 }
   0x4   :  { %s1069_s21 = smov 8   ;;  %s1070_s22 = smov [#allocation2]  }
   0x5   :  { %34 = dma.hbm_to_vmem [thread:$0]  %s27_s14, 24576, %s29_s16, [#allocation6], %s1068_s20, %s1068_s20, %s1069_s21  }
   0x6   :  { %s18_s23 = sshll.u32 %s1070_s22, 4  ;;  %s40_s26 = sshll.u32 %s1107_s2, 4  ;;  %s19_s23 = int_to_ptr.vmem [resolvable:$true] %s18_s23  ;;  %s41_s26 = int_to_ptr.hbm [resolvable:$true] %s40_s26 }
   0x7   :  { %21 = dma.hbm_to_vmem [thread:$0]  %s17_s19, 128, %s19_s23, [#allocation3]  }
   0x8   :  { %s1071_s1 = smov [#allocation7]  }
   0x9   :  { %s42_s27 = sshll.u32 %s1071_s1, 4  ;;  %s43_s27 = int_to_ptr.vmem [resolvable:$true] %s42_s27 }
   0xa   :  { %45 = dma.hbm_to_vmem [thread:$0]  %s41_s26, 112, %s43_s27, [#allocation6]  }
   0xb   :  { %1061 = dma.done.wait [#allocation3], 128  }
   0xc   :  { %1062 = vsyncadd [#allocation3], 4294967168 }
   0xd   :  { %1063 = dma.done.wait [#allocation6], 24688  }
   0xe   :  { %1064 = vsyncadd [#allocation6], 4294942608  ;;  %v666_v0 = vld [vmem:[#allocation5] sm:$0xf]  ;;  %v893_v1 = vld [vmem:[#allocation5 + $0x4] sm:$0xf0] }
   0xf   :  { %v59_v2 = vld [vmem:[#allocation2] sm:$0xff]  ;;  %v667_v3 = vor.u32 %v893_v1, %v666_v0  ;;  %v699_v4 = vld [vmem:[#allocation5 + $0x170] sm:$0xf]  ;;  %v695_v6 = vld [vmem:[#allocation5 + $0x160] sm:$0xf]  ;;  %vm73_vm0 = vcmask 130048  }
  0x10   :  { %v901_v5 = vld [vmem:[#allocation5 + $0x174] sm:$0xf0]  ;;  %v60_v7 = vpack.c.bf16 %v59_v2, %v59_v2  ;;  %v900_v9 = vld [vmem:[#allocation5 + $0x164] sm:$0xf0]  ;;  %v691_v11 = vld [vmem:[#allocation5 + $0x150] sm:$0xf] }
  0x11   :  { %v700_v8 = vor.u32 %v901_v5, %v699_v4  ;;  %84 = vmatpush.bf16.msra.mxu0 %v667_v3  ;;  %v696_v10 = vor.u32 %v900_v9, %v695_v6  ;;  %v899_v12 = vld [vmem:[#allocation5 + $0x154] sm:$0xf0]  ;;  %v687_v14 = vld [vmem:[#allocation5 + $0x140] sm:$0xf]  ;;  %v898_v15 = vld [vmem:[#allocation5 + $0x144] sm:$0xf0] }
  0x12   :  { %v692_v13 = vor.u32 %v899_v12, %v691_v11  ;;  %v688_v16 = vor.u32 %v898_v15, %v687_v14  ;;  %v683_v17 = vld [vmem:[#allocation5 + $0x130] sm:$0xf]  ;;  %v897_v18 = vld [vmem:[#allocation5 + $0x134] sm:$0xf0]  ;;  %v679_v20 = vld [vmem:[#allocation5 + $0x120] sm:$0xf] }
  0x13   :  { %162 = vmatpush.bf16.msra.mxu1 %v700_v8  ;;  %v684_v19 = vor.u32 %v897_v18, %v683_v17  ;;  %v896_v21 = vld [vmem:[#allocation5 + $0x124] sm:$0xf0]  ;;  %v675_v23 = vld [vmem:[#allocation5 + $0x110] sm:$0xf]  ;;  %v895_v24 = vld [vmem:[#allocation5 + $0x114] sm:$0xf0] }
  0x14   :  { %668 = vmatmul.msk.bf16.vlgmr.msra.gmra.mxu0 %vm73_vm0, %v60_v7  ;;  %v680_v22 = vor.u32 %v896_v21, %v679_v20  ;;  %v676_v25 = vor.u32 %v895_v24, %v675_v23  ;;  %v671_v26 = vld [vmem:[#allocation5 + $0x100] sm:$0xf]  ;;  %v894_v27 = vld [vmem:[#allocation5 + $0x104] sm:$0xf0]  ;;  %v731_v29 = vld [vmem:[#allocation5 + $0x270] sm:$0xf] }
  0x15   :  { %v672_v28 = vor.u32 %v894_v27, %v671_v26  ;;  %v909_v30 = vld [vmem:[#allocation5 + $0x274] sm:$0xf0]  ;;  %v727_v31 = vld [vmem:[#allocation5 + $0x260] sm:$0xf]  ;;  %v908_v33 = vld [vmem:[#allocation5 + $0x264] sm:$0xf0] }
  0x16   :  { %v732_v32 = vor.u32 %v909_v30, %v731_v29  ;;  %v728_v34 = vor.u32 %v908_v33, %v727_v31  ;;  %v723_v35 = vld [vmem:[#allocation5 + $0x250] sm:$0xf]  ;;  %v907_v36 = vld [vmem:[#allocation5 + $0x254] sm:$0xf0]  ;;  %v719_v38 = vld [vmem:[#allocation5 + $0x240] sm:$0xf] }
  0x17   :  { %163 = vmatpush.bf16.msra.mxu1 %v696_v10  ;;  %v724_v37 = vor.u32 %v907_v36, %v723_v35  ;;  %v906_v39 = vld [vmem:[#allocation5 + $0x244] sm:$0xf0]  ;;  %v715_v41 = vld [vmem:[#allocation5 + $0x230] sm:$0xf]  ;;  %v905_v42 = vld [vmem:[#allocation5 + $0x234] sm:$0xf0] }
  0x18   :  { %247 = vmatpush.bf16.msra.mxu2 %v732_v32  ;;  %v720_v40 = vor.u32 %v906_v39, %v719_v38  ;;  %v716_v43 = vor.u32 %v905_v42, %v715_v41  ;;  %v711_v44 = vld [vmem:[#allocation5 + $0x220] sm:$0xf]  ;;  %v904_v45 = vld [vmem:[#allocation5 + $0x224] sm:$0xf0]  ;;  %v707_v54 = vld [vmem:[#allocation5 + $0x210] sm:$0xf] }
  0x19   :  { %v712_v46 = vor.u32 %v904_v45, %v711_v44  ;;  %v956_v47 = vld [vmem:[#allocation7] ss:$0 sm:$0xff]  ;;  %v903_v55 = vld [vmem:[#allocation5 + $0x214] sm:$0xf0]  ;;  %v902_v58 = vld [vmem:[#allocation5 + $0x204] sm:$0xf0] }
  0x1a   :  { %v708_v56 = vor.u32 %v903_v55, %v707_v54  ;;  %v703_v57 = vld [vmem:[#allocation5 + $0x200] sm:$0xf]  ;;  %v763_v60 = vld [vmem:[#allocation5 + $0x370] sm:$0xf]  ;;  %v917_v61 = vld [vmem:[#allocation5 + $0x374] sm:$0xf0] }
  0x1b   :  { %164 = vmatpush.bf16.msra.mxu1 %v692_v13  ;;  %v704_v59 = vor.u32 %v902_v58, %v703_v57  ;;  %v759_v62 = vld [vmem:[#allocation5 + $0x360] sm:$0xf]  ;;  %v764_v63 = vor.u32 %v917_v61, %v763_v60  ;;  %v916_v0 = vld [vmem:[#allocation5 + $0x364] sm:$0xf0]  ;;  %v755_v9 = vld [vmem:[#allocation5 + $0x350] sm:$0xf] }
  0x1c   :  { %248 = vmatpush.bf16.msra.mxu2 %v728_v34  ;;  %v760_v1 = vor.u32 %v916_v0, %v759_v62  ;;  %v957_v2 = vld [vmem:[#allocation7 + $0x1] ss:$0 sm:$0xff]  ;;  %v915_v10 = vld [vmem:[#allocation5 + $0x354] sm:$0xf0]  ;;  %v914_v13 = vld [vmem:[#allocation5 + $0x344] sm:$0xf0] }
  0x1d   :  { %335 = vmatpush.bf16.msra.mxu3 %v764_v63  ;;  %v756_v11 = vor.u32 %v915_v10, %v755_v9  ;;  %v751_v12 = vld [vmem:[#allocation5 + $0x340] sm:$0xf]  ;;  %v747_v15 = vld [vmem:[#allocation5 + $0x330] sm:$0xf]  ;;  %v932_v29 = vld [vmem:[#allocation5 + $0x474] sm:$0xf] }
  0x1e   :  { %v752_v14 = vor.u32 %v914_v13, %v751_v12  ;;  %v743_v18 = vld [vmem:[#allocation5 + $0x320] sm:$0xf]  ;;  %v739_v21 = vld [vmem:[#allocation5 + $0x310] sm:$0xf]  ;;  %v825_v31 = vld [vmem:[#allocation5 + $0x478] sm:$0xf0] }
  0x1f   :  { %165 = vmatpush.bf16.msra.mxu1 %v688_v16  ;;  %v913_v16 = vld [vmem:[#allocation5 + $0x334] sm:$0xf0]  ;;  %v735_v24 = vld [vmem:[#allocation5 + $0x300] sm:$0xf]  ;;  %v823_v27 = vld [vmem:[#allocation5 + $0x470] sm:$0xf]  ;;  %v828_v34 = vor.u32 %v932_v29, %v825_v31 }
  0x20   :  { %249 = vmatpush.bf16.msra.mxu2 %v724_v37  ;;  %v748_v17 = vor.u32 %v913_v16, %v747_v15  ;;  %v815_v32 = vld [vmem:[#allocation5 + $0x460] sm:$0xf]  ;;  %v931_v33 = vld [vmem:[#allocation5 + $0x464] sm:$0xf0]  ;;  %v930_v35 = vld [vmem:[#allocation5 + $0x464] sm:$0xf] }
  0x21   :  { %336 = vmatpush.bf16.msra.mxu3 %v760_v1  ;;  %v817_v36 = vld [vmem:[#allocation5 + $0x468] sm:$0xf0]  ;;  %v816_v37 = vor.u32 %v931_v33, %v815_v32  ;;  %v958_v38 = vld [vmem:[#allocation7 + $0x2] ss:$0 sm:$0xff]  ;;  %v929_v41 = vld [vmem:[#allocation5 + $0x454] sm:$0xf0] }
  0x22   :  { %v820_v39 = vor.u32 %v930_v35, %v817_v36  ;;  %v928_v42 = vld [vmem:[#allocation5 + $0x454] sm:$0xf]  ;;  %v925_v57 = vld [vmem:[#allocation5 + $0x434] sm:$0xf0]  ;;  %v783_v63 = vld [vmem:[#allocation5 + $0x420] sm:$0xf] }
  0x23   :  { %166 = vmatpush.bf16.msra.mxu1 %v684_v19  ;;  %v912_v19 = vld [vmem:[#allocation5 + $0x324] sm:$0xf0]  ;;  %v924_v58 = vld [vmem:[#allocation5 + $0x434] sm:$0xf]  ;;  %v922_v1 = vld [vmem:[#allocation5 + $0x424] sm:$0xf] }
  0x24   :  { %250 = vmatpush.bf16.msra.mxu2 %v720_v40  ;;  %v744_v20 = vor.u32 %v912_v19, %v743_v18  ;;  %v807_v40 = vld [vmem:[#allocation5 + $0x450] sm:$0xf]  ;;  %v923_v0 = vld [vmem:[#allocation5 + $0x424] sm:$0xf0]  ;;  %v921_v10 = vld [vmem:[#allocation5 + $0x414] sm:$0xf0] }
  0x25   :  { %337 = vmatpush.bf16.msra.mxu3 %v756_v11  ;;  %v808_v45 = vor.u32 %v929_v41, %v807_v40  ;;  %v775_v9 = vld [vmem:[#allocation5 + $0x410] sm:$0xf]  ;;  %v920_v11 = vld [vmem:[#allocation5 + $0x414] sm:$0xf]  ;;  %v777_v13 = vld [vmem:[#allocation5 + $0x418] sm:$0xf0] }
  0x26   :  { %v776_v12 = vor.u32 %v921_v10, %v775_v9  ;;  %v767_v15 = vld [vmem:[#allocation5 + $0x400] sm:$0xf]  ;;  %v919_v16 = vld [vmem:[#allocation5 + $0x404] sm:$0xf0]  ;;  %v769_v19 = vld [vmem:[#allocation5 + $0x408] sm:$0xf0] }
  0x27   :  { %167 = vmatpush.bf16.msra.mxu1 %v680_v22  ;;  %v911_v22 = vld [vmem:[#allocation5 + $0x314] sm:$0xf0]  ;;  %v768_v18 = vor.u32 %v919_v16, %v767_v15  ;;  %v887_v29 = vld [vmem:[#allocation5 + $0x5e0] sm:$0xf]  ;;  %v851_v33 = vld [vmem:[#allocation5 + $0x550] sm:$0xf] }
  0x28   :  { %251 = vmatpush.bf16.msra.mxu2 %v716_v43  ;;  %v740_v23 = vor.u32 %v911_v22, %v739_v21  ;;  %v809_v43 = vld [vmem:[#allocation5 + $0x458] sm:$0xf0]  ;;  %v859_v21 = vld [vmem:[#allocation5 + $0x570] sm:$0xf]  ;;  %v941_v22 = vld [vmem:[#allocation5 + $0x574] sm:$0xf0] }
  0x29   :  { %338 = vmatpush.bf16.msra.mxu3 %v752_v14  ;;  %v780_v14 = vor.u32 %v920_v11, %v777_v13  ;;  %v883_v35 = vld [vmem:[#allocation5 + $0x5d0] sm:$0xf]  ;;  %v947_v36 = vld [vmem:[#allocation5 + $0x5d4] sm:$0xf0]  ;;  %v938_v40 = vld [vmem:[#allocation5 + $0x544] sm:$0xf0] }
  0x2a   :  { %v879_v41 = vld [vmem:[#allocation5 + $0x5c0] sm:$0xf]  ;;  %v942_v10 = vld [vmem:[#allocation5 + $0x584] sm:$0xf0]  ;;  %s1072_s0 = smov [#allocation8]   ;;  %s653_s30 = sshll.u32 %s1108_s3, 4  ;;  %s654_s30 = int_to_ptr.hbm [resolvable:$true] %s653_s30 }
  0x2b   :  { %168 = vmatpush.bf16.msra.mxu1 %v676_v25  ;;  %v910_v25 = vld [vmem:[#allocation5 + $0x304] sm:$0xf0]  ;;  %s651_s2 = sshll.u32 %s1072_s0, 4  ;;  %s652_s2 = int_to_ptr.vmem [resolvable:$true] %s651_s2 }
  0x2c   :  { %252 = vmatpush.bf16.msra.mxu2 %v712_v46  ;;  %v736_v26 = vor.u32 %v910_v25, %v735_v24  ;;  %v860_v24 = vor.u32 %v941_v22, %v859_v21  ;;  %v949_v25 = vld [vmem:[#allocation5 + $0x5f4] sm:$0xf0] }
  0x2d   :  { %339 = vmatpush.bf16.msra.mxu3 %v748_v17  ;;  %v918_v17 = vld [vmem:[#allocation5 + $0x404] sm:$0xf] }
  0x2f   :  { %169 = vmatpush.bf16.msra.mxu1 %v672_v28  ;;  %v933_v28 = vld [vmem:[#allocation5 + $0x474] sm:$0xf0] }
  0x30   :  { %253 = vmatpush.bf16.msra.mxu2 %v708_v56  ;;  %v824_v30 = vor.u32 %v933_v28, %v823_v27  ;;  %v791_v56 = vld [vmem:[#allocation5 + $0x430] sm:$0xf]  ;;  %v940_v27 = vld [vmem:[#allocation5 + $0x564] sm:$0xf0] }
  0x31   :  { %340 = vmatpush.bf16.msra.mxu3 %v744_v20  ;;  %v792_v61 = vor.u32 %v925_v57, %v791_v56  ;;  %v772_v20 = vor.u32 %v918_v17, %v769_v19  ;;  %v959_v56 = vld [vmem:[#allocation7 + $0x3] ss:$0 sm:$0xff] }
  0x32   :  { %454 = vmatpush.bf16.msrb.mxu0 %v824_v30  ;;  %v948_v30 = vld [vmem:[#allocation5 + $0x5e4] sm:$0xf0] }
  0x33   :  { %467 = vmatpush.bf16.msrb.mxu1 %v828_v34  ;;  %v888_v32 = vor.u32 %v948_v30, %v887_v29  ;;  %v939_v34 = vld [vmem:[#allocation5 + $0x554] sm:$0xf0] }
  0x34   :  { %254 = vmatpush.bf16.msra.mxu2 %v704_v59  ;;  %v793_v59 = vld [vmem:[#allocation5 + $0x438] sm:$0xf0] }
  0x35   :  { %341 = vmatpush.bf16.msra.mxu3 %v740_v23  ;;  %v796_v62 = vor.u32 %v924_v58, %v793_v59  ;;  %v891_v23 = vld [vmem:[#allocation5 + $0x5f0] sm:$0xf] }
  0x36   :  { %455 = vmatpush.bf16.msrb.mxu0 %v816_v37  ;;  %v892_v28 = vor.u32 %v949_v25, %v891_v23  ;;  %v852_v37 = vor.u32 %v939_v34, %v851_v33 }
  0x37   :  { %468 = vmatpush.bf16.msrb.mxu1 %v820_v39  ;;  %v847_v39 = vld [vmem:[#allocation5 + $0x540] sm:$0xf] }
  0x38   :  { %619 = vmatpush.bf16.msrb.mxu2 %v860_v24 }
  0x39   :  { %342 = vmatpush.bf16.msra.mxu3 %v736_v26  ;;  %v855_v26 = vld [vmem:[#allocation5 + $0x560] sm:$0xf] }
  0x3a   :  { %456 = vmatpush.bf16.msrb.mxu0 %v808_v45  ;;  %v856_v31 = vor.u32 %v940_v27, %v855_v26  ;;  %v843_v45 = vld [vmem:[#allocation5 + $0x530] sm:$0xf]  ;;  %v960_v27 = vld [vmem:[#allocation7 + $0x6] ss:$0 sm:$0xff] }
  0x3c   :  { %620 = vmatpush.bf16.msrb.mxu2 %v856_v31 }
  0x3d   :  { %632 = vmatpush.bf16.msrb.mxu3 %v892_v28 }
  0x40   :  { %621 = vmatpush.bf16.msrb.mxu2 %v852_v37 }
  0x41   :  { %633 = vmatpush.bf16.msrb.mxu3 %v888_v32 }
  0x91   :  { %v86_v48 = vpop.f32.mrf.mxu0 }
  0x92   :  { %v87_v49 = vadd.f32 %v956_v47, %v86_v48  ;;  %v812_v47 = vor.u32 %v928_v42, %v809_v43  ;;  %v799_v48 = vld [vmem:[#allocation5 + $0x440] sm:$0xf]  ;;  %v946_v42 = vld [vmem:[#allocation5 + $0x5c4] sm:$0xf0]  ;;  %v848_v43 = vor.u32 %v938_v40, %v847_v39 }
  0x94   :  { %v90_v50 = vmul.f32 0.01, %v87_v49  ;;  %469 = vmatpush.bf16.msrb.mxu1 %v812_v47  ;;  %v875_v47 = vld [vmem:[#allocation5 + $0x5b0] sm:$0xf]  ;;  %622 = vmatpush.bf16.msrb.mxu2 %v848_v43 }
  0x96   :  { %v91_v51 = vmax.f32 %v87_v49, %v90_v50  ;;  %v927_v49 = vld [vmem:[#allocation5 + $0x444] sm:$0xf0]  ;;  %v926_v50 = vld [vmem:[#allocation5 + $0x444] sm:$0xf] }
  0x98   :  { %v92_v52 = vpack.c.bf16 %v91_v51, %v91_v51  ;;  %v801_v51 = vld [vmem:[#allocation5 + $0x448] sm:$0xf0] }
  0x99   :  { %v88_v53 = vpop.f32.mrf.mxu0  ;;  %v804_v55 = vor.u32 %v926_v50, %v801_v51  ;;  %v839_v51 = vld [vmem:[#allocation5 + $0x520] sm:$0xf] }
  0x9a   :  { %170 = vmatmul.bf16.vlgmr.msra.gmra.mxu1 %v92_v52  ;;  %v800_v53 = vor.u32 %v927_v49, %v799_v48  ;;  %v945_v48 = vld [vmem:[#allocation5 + $0x5b4] sm:$0xf0] }
  0x9b   :  { %470 = vmatpush.bf16.msrb.mxu1 %v804_v55  ;;  %v876_v50 = vor.u32 %v945_v48, %v875_v47 }
  0x9c   :  { %457 = vmatpush.bf16.msrb.mxu0 %v800_v53  ;;  %v871_v53 = vld [vmem:[#allocation5 + $0x5a0] sm:$0xf] }
  0x9f   :  { %471 = vmatpush.bf16.msrb.mxu1 %v796_v62 }
  0xa0   :  { %458 = vmatpush.bf16.msrb.mxu0 %v792_v61 }
 0x117   :  { %v171_v3 = vpop.f32.mrf.mxu1 }
 0x118   :  { %v172_v4 = vadd.f32 %v957_v2, %v171_v3  ;;  %v785_v2 = vld [vmem:[#allocation5 + $0x428] sm:$0xf0]  ;;  %v784_v3 = vor.u32 %v923_v0, %v783_v63  ;;  %v835_v0 = vld [vmem:[#allocation5 + $0x510] sm:$0xf] }
 0x11a   :  { %v175_v5 = vmul.f32 0.01, %v172_v4  ;;  %459 = vmatpush.bf16.msrb.mxu0 %v784_v3  ;;  %v867_v3 = vld [vmem:[#allocation5 + $0x590] sm:$0xf] }
 0x11c   :  { %v176_v6 = vmax.f32 %v172_v4, %v175_v5  ;;  %v788_v5 = vor.u32 %v922_v1, %v785_v2  ;;  %v935_v1 = vld [vmem:[#allocation5 + $0x514] sm:$0xf0] }
 0x11d   :  { %v836_v2 = vor.u32 %v935_v1, %v835_v0 }
 0x11e   :  { %v177_v7 = vpack.c.bf16 %v176_v6, %v176_v6  ;;  %472 = vmatpush.bf16.msrb.mxu1 %v788_v5  ;;  %460 = vmatpush.bf16.msrb.mxu0 %v776_v12  ;;  %v368_v12 = vld [vmem:[#allocation7 + $0x4] sm:$0x3] }
 0x11f   :  { %v173_v8 = vpop.f32.mrf.mxu1  ;;  %v370_v13 = vperm.slane %v368_v12, 0 }
 0x120   :  { %255 = vmatmul.bf16.vlgmr.msra.gmra.mxu2 %v177_v7 }
 0x122   :  { %473 = vmatpush.bf16.msrb.mxu1 %v780_v14  ;;  %461 = vmatpush.bf16.msrb.mxu0 %v768_v18  ;;  %v371_v14 = vperm.slane %v368_v12, 1 }
 0x126   :  { %474 = vmatpush.bf16.msrb.mxu1 %v772_v20 }
 0x1a3   :  { %v256_v44 = vpop.f32.mrf.mxu2 }
 0x1a4   :  { %v257_v46 = vadd.f32 %v958_v38, %v256_v44  ;;  %v884_v38 = vor.u32 %v947_v36, %v883_v35  ;;  %v880_v44 = vor.u32 %v946_v42, %v879_v41 }
 0x1a6   :  { %v260_v52 = vsub.f32 0.0, %v257_v46  ;;  %634 = vmatpush.bf16.msrb.mxu3 %v884_v38  ;;  %v937_v46 = vld [vmem:[#allocation5 + $0x534] sm:$0xf0] }
 0x1a7   :  { %v844_v49 = vor.u32 %v937_v46, %v843_v45 }
 0x1a8   :  { %v261_v54 = vmul.f32 1.442695, %v260_v52  ;;  %v936_v52 = vld [vmem:[#allocation5 + $0x524] sm:$0xf0] }
 0x1a9   :  { %623 = vmatpush.bf16.msrb.mxu2 %v844_v49  ;;  %v840_v55 = vor.u32 %v936_v52, %v839_v51 }
 0x1aa   :  { %961 = vpow2.f32 %v261_v54  ;;  %635 = vmatpush.bf16.msrb.mxu3 %v880_v44  ;;  %v944_v54 = vld [vmem:[#allocation5 + $0x5a4] sm:$0xf0] }
 0x1ab   :  { %v258_v60 = vpop.f32.mrf.mxu2  ;;  %v872_v57 = vor.u32 %v944_v54, %v871_v53 }
 0x1ad   :  { %624 = vmatpush.bf16.msrb.mxu2 %v840_v55 }
 0x1ae   :  { %636 = vmatpush.bf16.msrb.mxu3 %v876_v50 }
 0x1b0   :  { %v962_v4 = vpop.eup %961 }
 0x1b1   :  { %v263_v6 = vadd.f32 1.0, %v962_v4  ;;  %v943_v4 = vld [vmem:[#allocation5 + $0x594] sm:$0xf0]  ;;  %625 = vmatpush.bf16.msrb.mxu2 %v836_v2 }
 0x1b2   :  { %637 = vmatpush.bf16.msrb.mxu3 %v872_v57  ;;  %v868_v5 = vor.u32 %v943_v4, %v867_v3 }
 0x1b3   :  { %963 = vrcp.f32 %v263_v6  ;;  %v831_v6 = vld [vmem:[#allocation5 + $0x500] sm:$0xf] }
 0x1b6   :  { %638 = vmatpush.bf16.msrb.mxu3 %v868_v5 }
 0x1b9   :  { %v964_v7 = vpop.eup %963 }
 0x1ba   :  { %v265_v8 = vpack.c.bf16 %v964_v7, %v964_v7  ;;  %v934_v7 = vld [vmem:[#allocation5 + $0x504] sm:$0xf0] }
 0x1bb   :  { %v832_v9 = vor.u32 %v934_v7, %v831_v6 }
 0x1bc   :  { %343 = vmatmul.bf16.vlgmr.msra.gmra.mxu3 %v265_v8  ;;  %v863_v8 = vld [vmem:[#allocation5 + $0x580] sm:$0xf] }
 0x1bd   :  { %v864_v11 = vor.u32 %v942_v10, %v863_v8  ;;  %626 = vmatpush.bf16.msrb.mxu2 %v832_v9 }
 0x1bf   :  { %639 = vmatpush.bf16.msrb.mxu3 %v864_v11 }
 0x23f   :  { %v344_v58 = vpop.f32.mrf.mxu3 }
 0x240   :  { %v345_v59 = vadd.f32 %v959_v56, %v344_v58 }
 0x242   :  { %v348_v60 = vmul.f32 0.01, %v345_v59 }
 0x244   :  { %v349_v61 = vmax.f32 %v345_v59, %v348_v60 }
 0x246   :  { %v350_v62 = vpack.c.bf16 %v349_v61, %v349_v61 }
 0x247   :  { %v346_v63 = vpop.f32.mrf.mxu3 }
 0x248   :  { %462 = vmatmul.bf16.vlgmr.msrb.gmra.mxu0 %v350_v62  ;;  %475 = vmatmul.bf16.vlgmr.msrb.gmra.mxu1 %v350_v62 }
 0x2c5   :  { %v463_v15 = vpop.f32.mrf.mxu0  ;;  %v476_v16 = vpop.f32.mrf.mxu1 }
 0x2c6   :  { %v464_v17 = vadd.f32 %v463_v15, %v370_v13  ;;  %v477_v18 = vadd.f32 %v476_v16, %v371_v14 }
 0x2c8   :  { %v480_v19 = vmul.f32 0.01, %v464_v17  ;;  %v481_v20 = vmul.f32 0.01, %v477_v18 }
 0x2ca   :  { %v482_v21 = vmax.f32 %v464_v17, %v480_v19  ;;  %v483_v22 = vmax.f32 %v477_v18, %v481_v20 }
 0x2cc   :  { %v484_v23 = vpack.c.bf16 %v482_v21, %v482_v21  ;;  %v485_v24 = vpack.c.bf16 %v483_v22, %v483_v22 }
 0x2cd   :  { %v465_v25 = vpop.f32.mrf.mxu0  ;;  %v478_v26 = vpop.f32.mrf.mxu1 }
 0x2ce   :  { %627 = vmatmul.bf16.vlgmr.msrb.gmra.mxu2 %v484_v23  ;;  %640 = vmatmul.bf16.vlgmr.msrb.gmra.mxu3 %v485_v24 }
 0x351   :  { %v628_v28 = vpop.f32.mrf.mxu2  ;;  %v641_v29 = vpop.f32.mrf.mxu3 }
 0x352   :  { %v629_v30 = vadd.f32 %v960_v27, %v628_v28 }
 0x354   :  { %v642_v31 = vadd.f32 %v641_v29, %v629_v30 }
 0x356   :  { %645 = vst [vmem:[#allocation8] sm:$0xff] %v642_v31 }
 0x357   :  { %656 = dma.vmem_to_hbm [thread:$0]  %s652_s2, 128, %s654_s30, [#allocation4]  }
 0x359   :  { %v630_v32 = vpop.f32.mrf.mxu2  ;;  %v643_v33 = vpop.f32.mrf.mxu3 }
 0x35a   :  { %1065 = dma.done.wait [#allocation4], 128  }
 0x35b   :  { %1066 = vsyncadd [#allocation4], 4294967168 }
 0x35c   :  { %661 = vsyncpa [#allocation3], 1 }
 0x35d   :  { %662 = vsyncpa [#allocation6], 1 }
 0x35e   :  { %663 = vsyncpa [#allocation4], 1 }

</bundles_post_ra>
